<compile_context>
chip_gen: v7x
topology: tpu7x:2x2x1
jax: 0.10.0
libtpu: 0.0.40
codegen_flags: <defaults>
</compile_context>

<pallas_src>
import math
import jax
import jax.numpy as jnp
from jax import lax
from jax.experimental import pallas as pl
from jax.experimental.pallas import tpu as pltpu


def _cdiv(a, b):
    return -(-a // b)


def _round_up(x, m):
    return _cdiv(x, m) * m


def _vmem_capacity_bytes():
    """Generation-aware per-core VMEM capacity (fallback: v7x's 64 MiB)."""
    try:
        info = pltpu.get_tpu_info()
        cap = int(getattr(info, "vmem_capacity_bytes", 0) or 0)
        if cap > 0:
            return cap
    except Exception:
        pass
    return 64 * 1024 * 1024


def _balanced_tile(dim_aligned, gran, max_tile):
    """Tile size (multiple of `gran`) splitting `dim_aligned` into near-equal
    tiles of at most `max_tile` -> padding waste is < one granule per tile."""
    max_tile = max(gran, (max_tile // gran) * gran)
    n_tiles = _cdiv(dim_aligned, max_tile)
    return gran * _cdiv(dim_aligned // gran, n_tiles)


def _choose_tiles(M, K, N, in_itemsize, out_itemsize, use_acc, budget):
    """Pick (tm, tn, tk) that fit `budget` bytes of VMEM.

    Preference order: biggest K tile (fewest accumulator passes), full-N
    resident weights (x streamed from HBM exactly once), then the largest M
    tile that fits."""
    gran_m = 8 if in_itemsize >= 4 else (16 if in_itemsize == 2 else 32)
    m_aligned = _round_up(max(M, 1), gran_m)
    k_aligned = _round_up(max(K, 1), 128)
    n_aligned = _round_up(max(N, 1), 128)

    def need_bytes(tm, tn, tk):
        return (2 * tm * tk * in_itemsize          # x panel, double-buffered
                + 2 * tk * tn * in_itemsize        # W panel, double-buffered
                + 2 * tm * tn * out_itemsize       # output tile
                + (tm * tn * 4 if use_acc else 0)  # f32 accumulator scratch
                + 2 * tn * 4)                      # f32 bias tile

    best = None
    for tk_max in (1024, 512, 256, 128):
        tk = _balanced_tile(k_aligned, 128, min(tk_max, k_aligned))
        for tn_max in (n_aligned, 1024, 512, 256, 128):
            tn = _balanced_tile(n_aligned, 128, min(tn_max, n_aligned))
            for tm_max in (512, 256, 128, 64, 32, 16, 8):
                tm = _balanced_tile(m_aligned, gran_m,
                                    max(gran_m, min(tm_max, m_aligned)))
                if need_bytes(tm, tn, tk) > budget:
                    continue
                if best is None or tm > best[0]:
                    best = (tm, tn, tk)
                # Accept wide-N configs only if they leave a decent M tile;
                # otherwise fall through to narrower N panels.
                if tm >= min(m_aligned, 128):
                    return tm, tn, tk
                break  # largest fitting tm for this (tk, tn) found
    if best is not None:
        return best
    return gran_m, 128, 128  # minimal legal tiles (should never trigger)


def _make_fc_kernel(use_acc_scratch):
    """One (j, i, k) grid step of y = x @ W_t + b  (W_t already [K, N])."""
    if use_acc_scratch:
        def kernel(x_ref, w_ref, b_ref, o_ref, acc_ref):
            k = pl.program_id(2)

            @pl.when(k == 0)
            def _():
                # Seed the accumulator with the bias: no separate final add.
                acc_ref[...] = jnp.broadcast_to(b_ref[...], acc_ref.shape)

            acc_ref[...] += jnp.dot(x_ref[...], w_ref[...],
                                    preferred_element_type=jnp.float32)

            @pl.when(k == pl.num_programs(2) - 1)
            def _():
                o_ref[...] = acc_ref[...].astype(o_ref.dtype)
    else:
        # f32 output: accumulate directly into the K-resident output block.
        def kernel(x_ref, w_ref, b_ref, o_ref):
            k = pl.program_id(2)

            @pl.when(k == 0)
            def _():
                o_ref[...] = jnp.broadcast_to(b_ref[...], o_ref.shape)

            o_ref[...] += jnp.dot(x_ref[...], w_ref[...],
                                  preferred_element_type=jnp.float32)
    return kernel


def nonact_fc_forward(x, weight, bias, *, compute_dtype=jnp.bfloat16):
    """x: [..., in_features]; weight: [out, in]; bias: [out] -> [..., out]."""
    *lead, K = x.shape
    N, K_w = weight.shape
    assert K == K_w, "in_features mismatch"
    M = 1
    for d in lead:
        M *= d
    out_dtype = x.dtype

    cdt = jnp.dtype(compute_dtype)
    in_itemsize = cdt.itemsize
    out_itemsize = jnp.dtype(out_dtype).itemsize
    use_acc = jnp.dtype(out_dtype) != jnp.dtype(jnp.float32)

    # ---- Tile selection (balanced, VMEM-budgeted, generation-aware) --------
    vmem_cap = _vmem_capacity_bytes()
    budget = int(0.70 * vmem_cap)          # leave headroom for Mosaic scratch
    tm, tn, tk = _choose_tiles(M, K, N, in_itemsize, out_itemsize, use_acc,
                               budget)

    K_pad = _round_up(K, tk)
    grid_n = _cdiv(N, tn)
    grid_m = _cdiv(M, tm)
    grid_k = K_pad // tk

    # ---- One-pass operand prep ---------------------------------------------
    # Cast to the MXU compute dtype, transpose W once to [K, N] (plain
    # (tm,tk)@(tk,tn) dots -> no per-K-step XLU transpose), zero-pad K only.
    x2d = x.reshape(M, K).astype(cdt)
    w_t = weight.astype(cdt).T
    if K_pad != K:
        x2d = jnp.pad(x2d, ((0, 0), (0, K_pad - K)))
        w_t = jnp.pad(w_t, ((0, K_pad - K), (0, 0)))
    b2d = bias.astype(jnp.float32).reshape(1, N)

    # ---- VMEM limit + cost hint ---------------------------------------------
    need = (2 * tm * tk * in_itemsize + 2 * tk * tn * in_itemsize
            + 2 * tm * tn * out_itemsize + (tm * tn * 4 if use_acc else 0)
            + 2 * tn * 4)
    vmem_limit = int(min(0.9 * vmem_cap,
                         max(32 * 1024 * 1024, need + 8 * 1024 * 1024)))

    cost = pl.CostEstimate(
        flops=2 * M * N * K_pad,
        transcendentals=0,
        bytes_accessed=int(M * K_pad * in_itemsize * grid_n   # x, per N panel
                           + K_pad * N * in_itemsize * grid_m  # W, per M panel
                           + M * N * out_itemsize              # output
                           + N * 4),                           # bias
    )

    kernel = _make_fc_kernel(use_acc)
    scratch = [pltpu.VMEM((tm, tn), jnp.float32)] if use_acc else []

    out2d = pl.pallas_call(
        kernel,
        out_shape=jax.ShapeDtypeStruct((M, N), out_dtype),
        grid_spec=pltpu.PrefetchScalarGridSpec(
            num_scalar_prefetch=0,
            # N leads so v7x shards W's panels (the larger streamed operand)
            # across its two TensorCores; K (reduction) stays last.
            grid=(grid_n, grid_m, grid_k),
            in_specs=[
                pl.BlockSpec((tm, tk), lambda j, i, k: (i, k)),   # x rows
                pl.BlockSpec((tk, tn), lambda j, i, k: (k, j)),   # W^T panel
                pl.BlockSpec((1, tn), lambda j, i, k: (0, j)),    # f32 bias
            ],
            out_specs=pl.BlockSpec((tm, tn), lambda j, i, k: (i, j)),
            scratch_shapes=scratch,
        ),
        compiler_params=pltpu.CompilerParams(
            dimension_semantics=("parallel", "parallel", "arbitrary"),
            vmem_limit_bytes=vmem_limit,
        ),
        cost_estimate=cost,
    )(x2d, w_t, b2d)

    return out2d.reshape(*lead, N)


def init_linear_params(key, in_features, out_features, dtype=jnp.float32):
    """Matches nn.Linear default init: U(-1/sqrt(in), 1/sqrt(in))."""
    k_w, k_b = jax.random.split(key)
    bound = 1.0 / math.sqrt(in_features)
    weight = jax.random.uniform(
        k_w, (out_features, in_features), dtype=dtype, minval=-bound, maxval=bound
    )
    bias = jax.random.uniform(
        k_b, (out_features,), dtype=dtype, minval=-bound, maxval=bound
    )
    return weight, bias


def _reference(x, weight, bias, quantize_dtype=None):
    """Pure-JAX reference; optionally quantize operands like the kernel does."""
    if quantize_dtype is not None:
        x = x.astype(quantize_dtype)
        weight = weight.astype(quantize_dtype)
    y = jnp.einsum(
        "...i,oi->...o",
        x.astype(jnp.float32),
        weight.astype(jnp.float32),
        precision=lax.Precision.HIGHEST,
    )
    return y + bias.astype(jnp.float32)


if __name__ == "__main__":
    key = jax.random.PRNGKey(0)

    # --- Test 1: small [T, B, F] shapes, default bf16 compute ----------------
    k_x, k_p, key = jax.random.split(key, 3)
    T, B, in_f, out_f = 4, 2, 32, 32
    x = jax.random.normal(k_x, (T, B, in_f), dtype=jnp.float32)
    weight, bias = init_linear_params(k_p, in_f, out_f)

    y = jax.block_until_ready(nonact_fc_forward(x, weight, bias))
    assert y.shape == (T, B, out_f) and y.dtype == jnp.float32
    # Tight check against a reference using the same bf16-quantized operands.
    y_ref_q = _reference(x, weight, bias, quantize_dtype=jnp.bfloat16)
    assert jnp.allclose(y, y_ref_q, atol=1e-3, rtol=1e-3)
    # Loose check against the exact f32 reference (bf16 operand quantization).
    y_ref = _reference(x, weight, bias)
    assert jnp.allclose(y, y_ref, atol=2e-2, rtol=2e-2)

    # --- Test 2: ragged M/N + K padding (M=15, N=130, K=600 -> K_pad=640) ----
    k_x2, k_p2, key = jax.random.split(key, 3)
    T2, B2, in_f2, out_f2 = 3, 5, 600, 130
    x2 = jax.random.normal(k_x2, (T2, B2, in_f2), dtype=jnp.float32)
    weight2, bias2 = init_linear_params(k_p2, in_f2, out_f2)

    y2 = jax.block_until_ready(nonact_fc_forward(x2, weight2, bias2))
    assert y2.shape == (T2, B2, out_f2)
    y2_ref_q = _reference(x2, weight2, bias2, quantize_dtype=jnp.bfloat16)
    assert jnp.allclose(y2, y2_ref_q, atol=1e-3, rtol=1e-3)
    y2_ref = _reference(x2, weight2, bias2)
    assert jnp.allclose(y2, y2_ref, atol=2e-2, rtol=2e-2)

    # --- Test 3: multi-K-step accumulation, exact f32 compute path -----------
    k_x3, k_p3, key = jax.random.split(key, 3)
    T3, B3, in_f3, out_f3 = 2, 3, 1300, 130   # K > 1024 -> grid_k = 2
    x3 = jax.random.normal(k_x3, (T3, B3, in_f3), dtype=jnp.float32)
    weight3, bias3 = init_linear_params(k_p3, in_f3, out_f3)

    y3 = jax.block_until_ready(
        nonact_fc_forward(x3, weight3, bias3, compute_dtype=jnp.float32))
    assert y3.shape == (T3, B3, out_f3)
    y3_ref = _reference(x3, weight3, bias3)
    assert jnp.allclose(y3, y3_ref, atol=1e-4, rtol=1e-4)

    # --- Test 4: bf16 input/output (exercises the f32 accumulator scratch) ---
    k_x4, k_p4, key = jax.random.split(key, 3)
    T4, B4, in_f4, out_f4 = 2, 2, 64, 48
    x4 = jax.random.normal(k_x4, (T4, B4, in_f4), dtype=jnp.float32).astype(
        jnp.bfloat16)
    weight4, bias4 = init_linear_params(k_p4, in_f4, out_f4)

    y4 = jax.block_until_ready(nonact_fc_forward(x4, weight4, bias4))
    assert y4.shape == (T4, B4, out_f4) and y4.dtype == jnp.bfloat16
    y4_ref = _reference(x4, weight4, bias4, quantize_dtype=jnp.bfloat16)
    assert jnp.allclose(y4.astype(jnp.float32), y4_ref, atol=1e-2, rtol=1e-2)

    print("KERNEL_OK")
</pallas_src>

<mosaic_0001>
module attributes {stable_mosaic.version = 11 : i64} {
  func.func @kernel(%arg0: i32, %arg1: i32, %arg2: i32, %arg3: memref<16x128xbf16, #tpu.memory_space<vmem>>, %arg4: memref<128x128xbf16, #tpu.memory_space<vmem>>, %arg5: memref<1x128xf32, #tpu.memory_space<vmem>>, %arg6: memref<16x128xf32, #tpu.memory_space<vmem>>) attributes {dimension_semantics = [#tpu.dimension_semantics<parallel>, #tpu.dimension_semantics<parallel>, #tpu.dimension_semantics<arbitrary>], iteration_bounds = array<i64: 1, 1, 1>, scalar_prefetch = 0 : i64, scratch_operands = 0 : i64, tpu.core_type = #tpu.core_type<tc>, window_params = [{transform_indices = @transform_0, window_bounds = array<i64: 16, 128>}, {transform_indices = @transform_1, window_bounds = array<i64: 128, 128>}, {transform_indices = @transform_2, window_bounds = array<i64: 1, 128>}, {transform_indices = @transform_3, window_bounds = array<i64: 16, 128>}]} {
    %c0_i32 = arith.constant 0 : i32
    %0 = arith.cmpi eq, %arg2, %c0_i32 : i32
    %1 = arith.extui %0 : i1 to i32
    %c0_i32_0 = arith.constant 0 : i32
    %2 = arith.cmpi ne, %1, %c0_i32_0 : i32
    scf.if %2 {
      %c0_8 = arith.constant 0 : index
      %c0_9 = arith.constant 0 : index
      %9 = vector.load %arg5[%c0_8, %c0_9] : memref<1x128xf32, #tpu.memory_space<vmem>>, vector<1x128xf32>
      %10 = vector.shape_cast %9 : vector<1x128xf32> to vector<1x128xf32>
      %11 = vector.broadcast %10 : vector<1x128xf32> to vector<16x128xf32>
      %c0_10 = arith.constant 0 : index
      %c0_11 = arith.constant 0 : index
      %12 = vector.load %arg6[%c0_10, %c0_11] : memref<16x128xf32, #tpu.memory_space<vmem>>, vector<16x128xf32>
      tpu.vector_store %arg6[%c0_10, %c0_11], %11 {strides = array<i32>} : memref<16x128xf32, #tpu.memory_space<vmem>>, vector<16x128xf32>,
    } else {
    }
    %c0 = arith.constant 0 : index
    %c0_1 = arith.constant 0 : index
    %3 = vector.load %arg6[%c0, %c0_1] : memref<16x128xf32, #tpu.memory_space<vmem>>, vector<16x128xf32>
    %c0_2 = arith.constant 0 : index
    %c0_3 = arith.constant 0 : index
    %4 = vector.load %arg3[%c0_2, %c0_3] : memref<16x128xbf16, #tpu.memory_space<vmem>>, vector<16x128xbf16>
    %c0_4 = arith.constant 0 : index
    %c0_5 = arith.constant 0 : index
    %5 = vector.load %arg4[%c0_4, %c0_5] : memref<128x128xbf16, #tpu.memory_space<vmem>>, vector<128x128xbf16>
    %cst = arith.constant dense<0.000000e+00> : vector<16x128xf32>
    %6 = tpu.matmul %4, %5, %cst {dimension_numbers = #tpu.dot_dimension_numbers<[1], [0], [0], [1], [0, 0, 1, 1], [], []>} : vector<16x128xbf16>, vector<128x128xbf16>, vector<16x128xf32> -> vector<16x128xf32>
    %7 = arith.addf %3, %6 : vector<16x128xf32>
    %c0_6 = arith.constant 0 : index
    %c0_7 = arith.constant 0 : index
    %8 = vector.load %arg6[%c0_6, %c0_7] : memref<16x128xf32, #tpu.memory_space<vmem>>, vector<16x128xf32>
    tpu.vector_store %arg6[%c0_6, %c0_7], %7 {strides = array<i32>} : memref<16x128xf32, #tpu.memory_space<vmem>>, vector<16x128xf32>,
    return
  }
  func.func @transform_0(%arg0: i32, %arg1: i32, %arg2: i32) -> (i32, i32) {
    %c0_i32 = arith.constant 0 : i32
    return %arg1, %arg2 : i32, i32
  }
  func.func @transform_1(%arg0: i32, %arg1: i32, %arg2: i32) -> (i32, i32) {
    %c0_i32 = arith.constant 0 : i32
    return %arg2, %arg0 : i32, i32
  }
  func.func @transform_2(%arg0: i32, %arg1: i32, %arg2: i32) -> (i32, i32) {
    %c0_i32 = arith.constant 0 : i32
    %c0_i32_0 = arith.constant 0 : i32
    return %c0_i32, %arg0 : i32, i32
  }
  func.func @transform_3(%arg0: i32, %arg1: i32, %arg2: i32) -> (i32, i32) {
    %c0_i32 = arith.constant 0 : i32
    return %arg1, %arg0 : i32, i32
  }
}

</mosaic_0001>

<bundles_post_ra>
// kernel: tpu_custom_call.1
= control target key start
LH: loop header
LB: loop body
LE: loop exit
PB: predicated region body
PF: predicated region fallthrough
CT: control target
= control target key end

     0   :  { %8 = vsyncpa [#allocation3], 0  ;;  %v241_v1 = vmov 0.0   ;;  %vm242_vm0 = vmmov 0   ;;  %s308_s0 = inlined_call_operand.vmem [shape: bf16[8,128], index: 0, kind: input, shape index: {}]   ;;  %s309_s1 = inlined_call_operand.vmem [shape: bf16[128,32], index: 1, kind: input, shape index: {}]   ;;  %s310_s2 = inlined_call_operand.vmem [shape: f32[1,32], index: 2, kind: input, shape index: {}]   ;;  %s311_s3 = inlined_call_operand.hbm [shape: f32[8,32], index: 3, kind: output, shape index: {}]  }
   0x1   :  { %v208_v0 = vld [vmem:[%s309_s1] sm:$0xff]   ;;  %183 = vmatprep.subr.bf16.mxu0 %v241_v1  ;;  %v209_v2 = vld [vmem:[%s309_s1 + $0x8] sm:$0xff]   ;;  %199 = vmatprep.mubr.msk.bf16.mxu0 %vm242_vm0, %v241_v1  ;;  %v210_v3 = vld [vmem:[%s309_s1 + $0x10] sm:$0xff]  }
   0x2   :  { %184 = vmatpush3.bf16.msra.mxu0 %v208_v0  ;;  %v211_v4 = vld [vmem:[%s309_s1 + $0x18] sm:$0xff]   ;;  %v212_v5 = vld [vmem:[%s309_s1 + $0x20] sm:$0xff]   ;;  %v213_v6 = vld [vmem:[%s309_s1 + $0x28] sm:$0xff]  }
   0x3   :  { %185 = vmatprep.subr.bf16.mxu0 %v241_v1  ;;  %v214_v7 = vld [vmem:[%s309_s1 + $0x30] sm:$0xff]   ;;  %v215_v8 = vld [vmem:[%s309_s1 + $0x38] sm:$0xff]   ;;  %v216_v9 = vld [vmem:[%s308_s0] sm:$0xff]  }
   0x4   :  { %v164_v10 = vld [vmem:[%s310_s2] ss:$0 sm:$0xff] }
   0x6   :  { %186 = vmatpush3.bf16.msra.mxu0 %v209_v2 }
   0x7   :  { %187 = vmatprep.subr.bf16.mxu0 %v241_v1 }
   0xa   :  { %188 = vmatpush3.bf16.msra.mxu0 %v210_v3 }
   0xb   :  { %189 = vmatprep.subr.bf16.mxu0 %v241_v1 }
   0xe   :  { %190 = vmatpush3.bf16.msra.mxu0 %v211_v4 }
   0xf   :  { %191 = vmatprep.subr.bf16.mxu0 %v241_v1 }
  0x12   :  { %192 = vmatpush3.bf16.msra.mxu0 %v212_v5 }
  0x13   :  { %193 = vmatprep.subr.bf16.mxu0 %v241_v1 }
  0x16   :  { %194 = vmatpush3.bf16.msra.mxu0 %v213_v6 }
  0x17   :  { %195 = vmatprep.subr.bf16.mxu0 %v241_v1 }
  0x1a   :  { %196 = vmatpush3.bf16.msra.mxu0 %v214_v7 }
  0x1b   :  { %197 = vmatprep.subr.bf16.mxu0 %v241_v1 }
  0x1e   :  { %198 = vmatpush3.bf16.msra.mxu0 %v215_v8 }
  0x21   :  { %200 = vmatmul.mubr.bf16.vlgmr.msra.gmra.mrb[0].mxu0 %v216_v9 }
  0xf4   :  { %v137_v11 = vpop.f32.mrb[0].mxu0 }
  0xf5   :  { %v144_v12 = vadd.f32 %v164_v10, %v137_v11  ;;  %v201_v13 = vpop.f32.mrb[1].mxu0 }
  0xf6   :  { %v140_v14 = vpop.f32.mrb[2].mxu0 }
  0xf7   :  { %146 = vst [vmem:[#allocation2] sm:$0xff] %v144_v12  ;;  %v145_v15 = vadd.f32 %v164_v10, %v140_v14  ;;  %v202_v16 = vpop.f32.mrb[3].mxu0 }
  0xf9   :  { %147 = vst [vmem:[#allocation2 + $0x8] sm:$0xff] %v145_v15 }
  0xfa   :  { %152 = vsyncadd [#allocation3], 128  ;;  %s243_s1 = smov [#allocation2]  }
  0xfb   :  { %s153_s5 = sshll.u32 %s243_s1, 4  ;;  %s154_s5 = int_to_ptr.vmem [resolvable:$true] %s153_s5 }
  0xfc   :  { %s217_s6 = scalar_lea.vmem %s154_s5, 128  ;;  %s221_s0 = scalar_lea.vmem %s154_s5, 256 }
  0xfd   :  { %p218_p0 = scmp.ne.s32.totalorder %s154_s5, %s217_s6  ;;  %p222_p1 = scmp.lt.s32.totalorder %s154_s5, %s154_s5 }
  0xfe   :  { %p223_p2 = scmp.lt.s32.totalorder %s221_s0, %s217_s6 }
 0x100   :  { %p224_p3 = por %p223_p2, %p222_p1 }
 0x102   :  { %p225_p4 = pnand %p224_p3, %p218_p0 }
 0x104   :  { %228 = shalt.err (!%p225_p4)
}
 0x105   :  { %s229_s8 = scalar_lea.hbm %s311_s3, 128 }
 0x106   :  { %p230_p5 = scmp.ne.s32.totalorder %s311_s3, %s229_s8  ;;  %p233_p6 = scmp.lt.u32.totalorder %s229_s8, %s311_s3 }
 0x108   :  { %p235_p7 = pnand %p233_p6, %p230_p5 }
 0x10a   :  { %238 = shalt.err (!%p235_p7)
}
 0x10b   :  { %s244_s13 = smov 128   ;;  %s245_s14 = smov 8  }
 0x10c   :  { %159 = dma.vmem_to_hbm [thread:$0]  %s154_s5, 128, %s311_s3, [#allocation3], %s244_s13, %s244_s13, %s245_s14  }
 0x10d   :  { %239 = dma.done.wait [#allocation3], 256  }
 0x10e   :  { %240 = vsyncadd [#allocation3], 4294967040 }
 0x10f   :  { %163 = vsyncpa [#allocation3], 1 }

</bundles_post_ra>
